<compile_context>
chip_gen: v5e
topology: v5e:2x2
jax: 0.10.0
libtpu: 0.0.40
codegen_flags: <defaults>
</compile_context>

<pallas_src>
import jax
import jax.numpy as jnp
from jax.experimental import pallas as pl
from jax.experimental.pallas import tpu as pltpu

IN_F = 2
HIDDEN = 100
OUT_F = 3
HIDDEN_PAD = 128   # lane-align hidden dim
OUT_PAD = 128      # lane-dense output slab


def _mlp_kernel(x_ref, w1_ref, b1_ref, w2_ref, b2_ref, o_ref):
    x = x_ref[...]                                   # (TB, 2) f32
    # fc1 as two VPU broadcast FMAs (K=2 would waste the MXU's systolic depth).
    h = (x[:, 0:1] * w1_ref[0:1, :]
         + x[:, 1:2] * w1_ref[1:2, :]
         + b1_ref[...])                              # (TB, 128)
    # sigmoid: exp on the EUP slot, add/mul on the VPU.
    h = 1.0 / (1.0 + jnp.exp(-h))
    # fc2 on the MXU: (TB, 128) @ (128, 128) + (1, 128)  -> lane-dense store.
    y = jnp.dot(h, w2_ref[...], preferred_element_type=jnp.float32) + b2_ref[...]
    o_ref[...] = y.astype(o_ref.dtype)


def net_forward(x, w1, b1, w2, b2, *, tb=1024):
    """x: (B, 2) f32. w1: (2,100), b1: (1,100), w2: (100,3), b2: (1,3).

    Returns (B, 3) f32, identical to sigmoid(x @ w1 + b1) @ w2 + b2.
    """
    B = x.shape[0]

    # Tile size: multiple of 8 sublanes, capped so tiny batches stay tiny.
    tb = int(min(tb, max(8, ((B + 7) // 8) * 8)))
    n_tiles = pl.cdiv(B, tb)
    b_pad = n_tiles * tb

    # Zero-pad batch (rows are independent) and pad params to lane-aligned
    # shapes. Zero padding of w2 rows/cols and b1/b2 lanes preserves the math.
    x_p = x if b_pad == B else jnp.pad(x, ((0, b_pad - B), (0, 0)))
    w1_p = jnp.pad(w1, ((0, 0), (0, HIDDEN_PAD - HIDDEN)))          # (2, 128)
    b1_p = jnp.pad(b1, ((0, 0), (0, HIDDEN_PAD - HIDDEN)))          # (1, 128)
    w2_p = jnp.pad(w2, ((0, HIDDEN_PAD - HIDDEN), (0, OUT_PAD - OUT_F)))  # (128, 128)
    b2_p = jnp.pad(b2, ((0, 0), (0, OUT_PAD - OUT_F)))              # (1, 128)

    cost = pl.CostEstimate(
        flops=2 * b_pad * (IN_F * HIDDEN_PAD + HIDDEN_PAD * OUT_PAD),
        transcendentals=b_pad * HIDDEN_PAD,
        bytes_accessed=4 * (b_pad * IN_F + b_pad * OUT_PAD
                            + IN_F * HIDDEN_PAD + HIDDEN_PAD * OUT_PAD
                            + HIDDEN_PAD + OUT_PAD),
    )

    out = pl.pallas_call(
        _mlp_kernel,
        out_shape=jax.ShapeDtypeStruct((b_pad, OUT_PAD), jnp.float32),
        grid=(n_tiles,),
        in_specs=[
            pl.BlockSpec((tb, IN_F), lambda i: (i, 0)),              # x tile
            pl.BlockSpec((IN_F, HIDDEN_PAD), lambda i: (0, 0)),      # w1 (invariant)
            pl.BlockSpec((1, HIDDEN_PAD), lambda i: (0, 0)),         # b1 (invariant)
            pl.BlockSpec((HIDDEN_PAD, OUT_PAD), lambda i: (0, 0)),   # w2 (invariant)
            pl.BlockSpec((1, OUT_PAD), lambda i: (0, 0)),            # b2 (invariant)
        ],
        out_specs=pl.BlockSpec((tb, OUT_PAD), lambda i: (i, 0)),     # lane-dense slab
        compiler_params=pltpu.CompilerParams(
            dimension_semantics=("parallel",),
        ),
        cost_estimate=cost,
    )(x_p, w1_p, b1_p, w2_p, b2_p)

    return out[:B, :OUT_F]


def init_params(key):
    """Deterministic init mirroring PyTorch nn.Linear default (U(+-1/sqrt(fan_in))).

    Weights are stored as (in_features, out_features) at their *logical*
    (unpadded) shapes; net_forward handles lane padding internally.
    """
    k1, k2, k3, k4 = jax.random.split(key, 4)
    bound1 = 1.0 / jnp.sqrt(2.0)     # fan_in of fc1 = 2
    bound2 = 1.0 / jnp.sqrt(100.0)   # fan_in of fc2 = 100
    w1 = jax.random.uniform(k1, (IN_F, HIDDEN), jnp.float32, -bound1, bound1)
    b1 = jax.random.uniform(k2, (1, HIDDEN), jnp.float32, -bound1, bound1)
    w2 = jax.random.uniform(k3, (HIDDEN, OUT_F), jnp.float32, -bound2, bound2)
    b2 = jax.random.uniform(k4, (1, OUT_F), jnp.float32, -bound2, bound2)
    return w1, b1, w2, b2


if __name__ == "__main__":
    key = jax.random.PRNGKey(0)
    k_x, k_p = jax.random.split(key)

    batch = 8
    x = jax.random.normal(k_x, (batch, IN_F), jnp.float32)
    w1, b1, w2, b2 = init_params(k_p)

    out = net_forward(x, w1, b1, w2, b2)
    out = jax.block_until_ready(out)

    # Pure-JAX reference of the same math (unpadded).
    h_ref = jax.nn.sigmoid(x @ w1 + b1)
    y_ref = h_ref @ w2 + b2
    assert out.shape == (batch, OUT_F)
    assert jnp.allclose(out, y_ref, atol=1e-5, rtol=1e-5)

    print("KERNEL_OK")
</pallas_src>

<mosaic_0001>
module attributes {stable_mosaic.version = 11 : i64} {
  func.func @_mlp_kernel(%arg0: i32, %arg1: memref<8x2xf32, #tpu.memory_space<vmem>>, %arg2: memref<2x128xf32, #tpu.memory_space<vmem>>, %arg3: memref<1x128xf32, #tpu.memory_space<vmem>>, %arg4: memref<128x128xf32, #tpu.memory_space<vmem>>, %arg5: memref<1x128xf32, #tpu.memory_space<vmem>>, %arg6: memref<8x128xf32, #tpu.memory_space<vmem>>) attributes {dimension_semantics = [#tpu.dimension_semantics<parallel>], iteration_bounds = array<i64: 1>, scalar_prefetch = 0 : i64, scratch_operands = 0 : i64, tpu.core_type = #tpu.core_type<tc>, window_params = [{transform_indices = @transform_0, window_bounds = array<i64: 8, 2>}, {pipeline_mode = #tpu.pipeline_mode<synchronous>, transform_indices = @transform_1, window_bounds = array<i64: 2, 128>}, {pipeline_mode = #tpu.pipeline_mode<synchronous>, transform_indices = @transform_2, window_bounds = array<i64: 1, 128>}, {pipeline_mode = #tpu.pipeline_mode<synchronous>, transform_indices = @transform_3, window_bounds = array<i64: 128, 128>}, {pipeline_mode = #tpu.pipeline_mode<synchronous>, transform_indices = @transform_4, window_bounds = array<i64: 1, 128>}, {transform_indices = @transform_5, window_bounds = array<i64: 8, 128>}]} {
    %c0 = arith.constant 0 : index
    %c0_0 = arith.constant 0 : index
    %0 = vector.load %arg1[%c0, %c0_0] : memref<8x2xf32, #tpu.memory_space<vmem>>, vector<8x2xf32>
    %1 = vector.extract_strided_slice %0 {offsets = [0, 0], sizes = [8, 1], strides = [1, 1]} : vector<8x2xf32> to vector<8x1xf32>
    %c0_1 = arith.constant 0 : index
    %c0_2 = arith.constant 0 : index
    %2 = vector.load %arg2[%c0_1, %c0_2] : memref<2x128xf32, #tpu.memory_space<vmem>>, vector<1x128xf32>
    %3 = vector.broadcast %1 : vector<8x1xf32> to vector<8x128xf32>
    %4 = vector.broadcast %2 : vector<1x128xf32> to vector<8x128xf32>
    %5 = arith.mulf %3, %4 : vector<8x128xf32>
    %6 = vector.extract_strided_slice %0 {offsets = [0, 1], sizes = [8, 1], strides = [1, 1]} : vector<8x2xf32> to vector<8x1xf32>
    %c1 = arith.constant 1 : index
    %c0_3 = arith.constant 0 : index
    %7 = vector.load %arg2[%c1, %c0_3] : memref<2x128xf32, #tpu.memory_space<vmem>>, vector<1x128xf32>
    %8 = vector.broadcast %6 : vector<8x1xf32> to vector<8x128xf32>
    %9 = vector.broadcast %7 : vector<1x128xf32> to vector<8x128xf32>
    %10 = arith.mulf %8, %9 : vector<8x128xf32>
    %11 = arith.addf %5, %10 : vector<8x128xf32>
    %c0_4 = arith.constant 0 : index
    %c0_5 = arith.constant 0 : index
    %12 = vector.load %arg3[%c0_4, %c0_5] : memref<1x128xf32, #tpu.memory_space<vmem>>, vector<1x128xf32>
    %13 = vector.broadcast %12 : vector<1x128xf32> to vector<8x128xf32>
    %14 = arith.addf %11, %13 : vector<8x128xf32>
    %cst = arith.constant 0.000000e+00 : f32
    %15 = vector.broadcast %cst : f32 to vector<8x128xf32>
    %16 = arith.subf %15, %14 : vector<8x128xf32>
    %17 = math.exp %16 : vector<8x128xf32>
    %cst_6 = arith.constant 1.000000e+00 : f32
    %18 = vector.broadcast %cst_6 : f32 to vector<8x128xf32>
    %19 = arith.addf %18, %17 : vector<8x128xf32>
    %cst_7 = arith.constant 1.000000e+00 : f32
    %20 = vector.broadcast %cst_7 : f32 to vector<8x128xf32>
    %21 = arith.divf %20, %19 : vector<8x128xf32>
    %c0_8 = arith.constant 0 : index
    %c0_9 = arith.constant 0 : index
    %22 = vector.load %arg4[%c0_8, %c0_9] : memref<128x128xf32, #tpu.memory_space<vmem>>, vector<128x128xf32>
    %cst_10 = arith.constant dense<0.000000e+00> : vector<8x128xf32>
    %23 = tpu.matmul %21, %22, %cst_10 {dimension_numbers = #tpu.dot_dimension_numbers<[1], [0], [0], [1], [0, 0, 1, 1], [], []>} : vector<8x128xf32>, vector<128x128xf32>, vector<8x128xf32> -> vector<8x128xf32>
    %c0_11 = arith.constant 0 : index
    %c0_12 = arith.constant 0 : index
    %24 = vector.load %arg5[%c0_11, %c0_12] : memref<1x128xf32, #tpu.memory_space<vmem>>, vector<1x128xf32>
    %25 = vector.broadcast %24 : vector<1x128xf32> to vector<8x128xf32>
    %26 = arith.addf %23, %25 : vector<8x128xf32>
    %c0_13 = arith.constant 0 : index
    %c0_14 = arith.constant 0 : index
    %27 = vector.load %arg6[%c0_13, %c0_14] : memref<8x128xf32, #tpu.memory_space<vmem>>, vector<8x128xf32>
    tpu.vector_store %arg6[%c0_13, %c0_14], %26 {strides = array<i32>} : memref<8x128xf32, #tpu.memory_space<vmem>>, vector<8x128xf32>,
    return
  }
  func.func @transform_0(%arg0: i32) -> (i32, i32) {
    %c0_i32 = arith.constant 0 : i32
    %c0_i32_0 = arith.constant 0 : i32
    return %arg0, %c0_i32 : i32, i32
  }
  func.func @transform_1(%arg0: i32) -> (i32, i32) {
    %c0_i32 = arith.constant 0 : i32
    %c0_i32_0 = arith.constant 0 : i32
    %c0_i32_1 = arith.constant 0 : i32
    return %c0_i32, %c0_i32_0 : i32, i32
  }
  func.func @transform_2(%arg0: i32) -> (i32, i32) {
    %c0_i32 = arith.constant 0 : i32
    %c0_i32_0 = arith.constant 0 : i32
    %c0_i32_1 = arith.constant 0 : i32
    return %c0_i32, %c0_i32_0 : i32, i32
  }
  func.func @transform_3(%arg0: i32) -> (i32, i32) {
    %c0_i32 = arith.constant 0 : i32
    %c0_i32_0 = arith.constant 0 : i32
    %c0_i32_1 = arith.constant 0 : i32
    return %c0_i32, %c0_i32_0 : i32, i32
  }
  func.func @transform_4(%arg0: i32) -> (i32, i32) {
    %c0_i32 = arith.constant 0 : i32
    %c0_i32_0 = arith.constant 0 : i32
    %c0_i32_1 = arith.constant 0 : i32
    return %c0_i32, %c0_i32_0 : i32, i32
  }
  func.func @transform_5(%arg0: i32) -> (i32, i32) {
    %c0_i32 = arith.constant 0 : i32
    %c0_i32_0 = arith.constant 0 : i32
    return %arg0, %c0_i32 : i32, i32
  }
}

</mosaic_0001>

<bundles_post_ra>
// kernel: tpu_custom_call.1
= control target key start
LH: loop header
LB: loop body
LE: loop exit
PB: predicated region body
PF: predicated region fallthrough
CT: control target
= control target key end

     0   :  { %10 = vsyncpa [#allocation3], 0  ;;  %s261_s0 = inlined_call_operand.vmem [shape: f32[8,2], index: 0, kind: input, shape index: {}]   ;;  %s262_s1 = inlined_call_operand.vmem [shape: f32[2,128], index: 1, kind: input, shape index: {}]   ;;  %s263_s2 = inlined_call_operand.vmem [shape: f32[1,128], index: 2, kind: input, shape index: {}]   ;;  %s264_s3 = inlined_call_operand.hbm [shape: f32[128,128], index: 3, kind: input, shape index: {}]   ;;  %s265_s4 = inlined_call_operand.vmem [shape: f32[1,128], index: 4, kind: input, shape index: {}]   ;;  %s266_s5 = inlined_call_operand.hbm [shape: f32[8,128], index: 5, kind: output, shape index: {}]  }
   0x1   :  { %11 = vsyncpa [#allocation4], 0  ;;  %s22_s20 = sshll.u32 %s264_s3, 4  ;;  %s204_s21 = smov [#allocation2]   ;;  %s23_s20 = int_to_ptr.hbm [resolvable:$true] %s22_s20 }
   0x2   :  { %s24_s22 = sshll.u32 %s204_s21, 4  ;;  %s205_s23 = smov 128   ;;  %s25_s22 = int_to_ptr.vmem [resolvable:$true] %s24_s22 }
   0x3   :  { %s206_s24 = smov 8  }
   0x4   :  { %30 = dma.hbm_to_vmem [thread:$0]  %s23_s20, 2048, %s25_s22, [#allocation3], %s205_s23, %s205_s23, %s206_s24  }
   0x5   :  { %200 = dma.done.wait [#allocation3], 2048  }
   0x6   :  { %201 = vsyncadd [#allocation3], 4294965248  ;;  %v207_v0 = vmov 0   ;;  %v37_v1 = vld [vmem:[%s261_s0] sm:$0xff]  ;;  %v208_v2 = vmov 1   ;;  %v93_v3 = vld [vmem:[#allocation2 + $0x78] sm:$0xff] }
   0x7   :  { %142 = vset.pattern.permute.xlu0 %v207_v0  ;;  %98 = vmatpush.msra.mxu0 %v93_v3  ;;  %v92_v4 = vld [vmem:[#allocation2 + $0x70] sm:$0xff]  ;;  %v91_v5 = vld [vmem:[#allocation2 + $0x68] sm:$0xff]  ;;  %v90_v6 = vld [vmem:[#allocation2 + $0x60] sm:$0xff]  ;;  %s209_s6 = smov [#allocation5]   ;;  %s126_s10 = sshll.u32 %s266_s5, 4  ;;  %s127_s10 = int_to_ptr.hbm [resolvable:$true] %s126_s10 }
   0x8   :  { %41 = vperm.xlu0 %142, %v37_v1   ;;  %v89_v7 = vld [vmem:[#allocation2 + $0x58] sm:$0xff]  ;;  %v88_v8 = vld [vmem:[#allocation2 + $0x50] sm:$0xff]  ;;  %v87_v9 = vld [vmem:[#allocation2 + $0x48] sm:$0xff]  ;;  %s124_s7 = sshll.u32 %s209_s6, 4  ;;  %s125_s7 = int_to_ptr.vmem [resolvable:$true] %s124_s7 }
   0x9   :  { %99 = vmatpush.msra.mxu0 %v92_v4  ;;  %v86_v10 = vld [vmem:[#allocation2 + $0x40] sm:$0xff]  ;;  %v85_v11 = vld [vmem:[#allocation2 + $0x38] sm:$0xff]  ;;  %v84_v12 = vld [vmem:[#allocation2 + $0x30] sm:$0xff] }
   0xa   :  { %v83_v14 = vld [vmem:[#allocation2 + $0x28] sm:$0xff]  ;;  %v82_v15 = vld [vmem:[#allocation2 + $0x20] sm:$0xff]  ;;  %v81_v16 = vld [vmem:[#allocation2 + $0x18] sm:$0xff] }
   0xb   :  { %100 = vmatpush.msra.mxu0 %v91_v5  ;;  %v144_v17 = vld [vmem:[%s262_s1] ss:$0 sm:$0xff]  ;;  %v145_v18 = vld [vmem:[%s262_s1 + $0x1] ss:$0 sm:$0xff]  ;;  %v80_v19 = vld [vmem:[#allocation2 + $0x10] sm:$0xff] }
   0xc   :  { %v79_v20 = vld [vmem:[#allocation2 + $0x8] sm:$0xff]  ;;  %v146_v23 = vld [vmem:[%s263_s2] ss:$0 sm:$0xff] }
   0xd   :  { %101 = vmatpush.msra.mxu0 %v90_v6  ;;  %v78_v25 = vld [vmem:[#allocation2] sm:$0xff] }
   0xe   :  { %v147_v42 = vld [vmem:[%s265_s4] ss:$0 sm:$0xff] }
   0xf   :  { %102 = vmatpush.msra.mxu0 %v89_v7 }
  0x10   :  { %143 = vset.pattern.permute.xlu0 %v208_v2 }
  0x11   :  { %48 = vperm.xlu0 %143, %v37_v1   ;;  %103 = vmatpush.msra.mxu0 %v88_v8 }
  0x13   :  { %104 = vmatpush.msra.mxu0 %v87_v9 }
  0x15   :  { %105 = vmatpush.msra.mxu0 %v86_v10 }
  0x17   :  { %106 = vmatpush.msra.mxu0 %v85_v11 }
  0x19   :  { %107 = vmatpush.msra.mxu0 %v84_v12 }
  0x1b   :  { %108 = vmatpush.msra.mxu0 %v83_v14 }
  0x1d   :  { %109 = vmatpush.msra.mxu0 %v82_v15 }
  0x1f   :  { %110 = vmatpush.msra.mxu0 %v81_v16 }
  0x21   :  { %111 = vmatpush.msra.mxu0 %v80_v19 }
  0x23   :  { %112 = vmatpush.msra.mxu0 %v79_v20 }
  0x25   :  { %113 = vmatpush.msra.mxu0 %v78_v25 }
  0x7a   :  { %v42_v13 = vpop.permute.xlu0 %41 }
  0x7b   :  { %v45_v22 = vmul.f32 %v144_v17, %v42_v13 }
  0x83   :  { %v49_v21 = vpop.permute.xlu0 %48 }
  0x84   :  { %v52_v24 = vmul.f32 %v145_v18, %v49_v21 }
  0x86   :  { %v53_v26 = vadd.f32 %v52_v24, %v45_v22 }
  0x88   :  { %v58_v27 = vadd.f32 %v146_v23, %v53_v26 }
  0x8a   :  { %v59_v28 = vsub.f32 0.0, %v58_v27 }
  0x8c   :  { %v60_v29 = vmul.f32 1.442695, %v59_v28 }
  0x8e   :  { %148 = vpow2.f32 %v60_v29 }
  0x94   :  { %v149_v30 = vpop.eup %148 }
  0x95   :  { %v62_v31 = vadd.f32 1.0, %v149_v30 }
  0x97   :  { %150 = vrcp.f32 %v62_v31  ;;  %v74_v35 = vand.u32 2147483648, %v62_v31  ;;  %v72_v37 = vand.u32 2147483647, %v62_v31  ;;  %vm68_vm1 = vweird.f32 %v62_v31 }
  0x99   :  { %v75_v39 = vor.u32 1.1754944e-38, %v74_v35  ;;  %vm73_vm3 = vcmp.eq.f32.partialorder %v72_v37, 8.507059e+37 }
  0x9d   :  { %v151_v32 = vpop.eup %150 }
  0x9e   :  { %v64_v33 = vmul.f32 %v151_v32, %v62_v31  ;;  %vm69_vm0 = vweird.f32 %v151_v32 }
  0x9f   :  { %vm70_vm2 = vmor %vm68_vm1, %vm69_vm0 }
  0xa0   :  { %v65_v34 = vsub.f32 1.0, %v64_v33 }
  0xa2   :  { %v66_v36 = vmul.f32 %v151_v32, %v65_v34 }
  0xa4   :  { %v67_v38 = vadd.f32 %v151_v32, %v66_v36 }
  0xa6   :  { %v71_v40 = vsel %vm70_vm2, %v151_v32, %v67_v38 }
  0xa7   :  { %v76_v41 = vsel %vm73_vm3, %v75_v39, %v71_v40 }
  0xa8   :  { %114 = vmatmul.f32.vlgmr.msra.gmra.mxu0 %v76_v41 }
 0x125   :  { %v115_v43 = vpop.f32.mrf.mxu0 }
 0x126   :  { %v116_v44 = vadd.f32 %v147_v42, %v115_v43 }
 0x128   :  { %118 = vst [vmem:[#allocation5] sm:$0xff] %v116_v44 }
 0x129   :  { %129 = dma.vmem_to_hbm [thread:$0]  %s125_s7, 128, %s127_s10, [#allocation4]  }
 0x12a   :  { %202 = dma.done.wait [#allocation4], 128  }
 0x12b   :  { %203 = vsyncadd [#allocation4], 4294967168 }
 0x12c   :  { %134 = vsyncpa [#allocation3], 1 }
 0x12d   :  { %135 = vsyncpa [#allocation4], 1 }

</bundles_post_ra>
